<compile_context>
chip_gen: v5e
topology: v5e:2x2
jax: 0.10.0
libtpu: 0.0.40
codegen_flags: <defaults>
</compile_context>

<pallas_src>
import jax
import jax.numpy as jnp
from jax.experimental import pallas as pl
from jax.experimental.pallas import tpu as pltpu


def conv2d_mm_kernel(p_ref, w_ref, o_ref):
    # p_ref: (K_pad, lane_tile)   im2col patches (+ ones bias row, + zero pad rows), lane-dense
    # w_ref: (OC_pad, K_pad)      flattened weights (+ bias column, + zero pad rows/cols)
    # o_ref: (OC_pad, lane_tile)  lane-dense output
    # Bias is folded into the contraction, so the body is a single unmasked MXU push.
    o_ref[...] = jnp.dot(
        w_ref[...], p_ref[...], preferred_element_type=jnp.float32
    ).astype(o_ref.dtype)


def _round_up(x, m):
    return ((x + m - 1) // m) * m


def _im2col(x, KH, KW):
    """x: (N, C, H, W) -> (C*KH*KW, N*P); tap order (c, kh, kw) matches OIHW weight flatten.

    P = OH*OW is kept contiguous per image (no per-image lane padding)."""
    N, C, H, W = x.shape
    OH = H - KH + 1
    OW = W - KW + 1
    P = OH * OW
    taps = []
    for kh in range(KH):          # static python loop, runs at trace time in the wrapper
        for kw in range(KW):
            taps.append(x[:, :, kh:kh + OH, kw:kw + OW].reshape(N, C, 1, P))
    p = jnp.concatenate(taps, axis=2)                 # (N, C, KH*KW, P)
    p = p.reshape(N, C * KH * KW, P)                  # row order = c*KH*KW + kh*KW + kw
    p = jnp.transpose(p, (1, 0, 2)).reshape(C * KH * KW, N * P)
    return p


_LANE_TILE_MAX = 2048   # per-block VMEM (double-buffered) stays well under v5e/v7x scoped limits


def conv2d_pallas(x, w, b):
    """x: (N, C, H, W) f32, w: (OC, C, KH, KW) f32, b: (OC,) f32 -> (N, OC, OH, OW) f32."""
    x = x.astype(jnp.float32)
    w = w.astype(jnp.float32)
    b = b.astype(jnp.float32)
    N, C, H, W = x.shape
    OC, IC, KH, KW = w.shape
    assert IC == C
    OH = H - KH + 1
    OW = W - KW + 1
    P = OH * OW
    CKK = C * KH * KW                      # 27
    K_pad = _round_up(CKK + 1, 8)          # +1 bias row -> 28 -> 32 (sublane aligned)
    OC_pad = _round_up(OC, 8)              # 6 -> 8 (unmasked stores)

    L = N * P                              # batch*spatial folded onto the lane axis
    lane_tile = min(_LANE_TILE_MAX, _round_up(L, 128))
    L_pad = _round_up(L, lane_tile)        # pad the TOTAL lane axis once
    grid = (L_pad // lane_tile,)

    # patches (K_pad, L_pad): rows 0..26 = taps, row 27 = 1.0 (bias), rows 28..31 = 0.
    patches = _im2col(x, KH, KW)                                        # (27, L)
    patches = jnp.concatenate(
        [patches, jnp.ones((1, L), jnp.float32)], axis=0)               # (28, L)
    patches = jnp.pad(patches, ((0, K_pad - (CKK + 1)), (0, L_pad - L)))  # (32, L_pad)

    # weights (OC_pad, K_pad): cols 0..26 = flattened OIHW taps, col 27 = bias, rest 0.
    w2 = jnp.concatenate([w.reshape(OC, CKK), b.reshape(OC, 1)], axis=1)  # (6, 28)
    w2 = jnp.pad(w2, ((0, OC_pad - OC), (0, K_pad - (CKK + 1))))          # (8, 32)

    out_flat = pl.pallas_call(
        conv2d_mm_kernel,
        out_shape=jax.ShapeDtypeStruct((OC_pad, L_pad), jnp.float32),
        grid=grid,
        in_specs=[
            pl.BlockSpec((K_pad, lane_tile), lambda i: (0, i)),
            pl.BlockSpec((OC_pad, K_pad), lambda i: (0, 0)),
        ],
        out_specs=pl.BlockSpec((OC_pad, lane_tile), lambda i: (0, i)),
        compiler_params=pltpu.CompilerParams(
            dimension_semantics=("parallel",)),   # lane tiles are independent (v7x 2-TC split)
    )(patches, w2)

    # Single un-pad slice + relayout back to NCHW (layout plumbing, not compute).
    out = out_flat[:OC, :L].reshape(OC, N, P)
    out = jnp.transpose(out, (1, 0, 2)).reshape(N, OC, OH, OW)
    return out


class TuduiPallas:
    """Pallas equivalent of the PyTorch Tudui module (single Conv2d(3, 6, 3x3, stride=1, pad=0))."""

    def __init__(self, key):
        kw_key, kb_key = jax.random.split(key)
        fan_in = 3 * 3 * 3
        bound = 1.0 / (fan_in ** 0.5)   # PyTorch default Conv2d init range
        self.weight = jax.random.uniform(
            kw_key, (6, 3, 3, 3), dtype=jnp.float32, minval=-bound, maxval=bound)
        self.bias = jax.random.uniform(
            kb_key, (6,), dtype=jnp.float32, minval=-bound, maxval=bound)

    def __call__(self, x):
        return conv2d_pallas(x, self.weight, self.bias)


if __name__ == "__main__":
    key = jax.random.PRNGKey(0)
    x_key, p_key = jax.random.split(key)

    # Small NCHW input consistent with the module (in_channels=3).
    x = jax.random.normal(x_key, (2, 3, 16, 16), dtype=jnp.float32)

    model = TuduiPallas(p_key)
    out = model(x)
    out = jax.block_until_ready(out)

    # Reference check against lax conv (NCHW, OIHW, valid padding).
    ref = jax.lax.conv_general_dilated(
        x, model.weight, window_strides=(1, 1), padding="VALID",
        dimension_numbers=("NCHW", "OIHW", "NCHW"),
    ) + model.bias.reshape(1, 6, 1, 1)

    assert out.shape == (2, 6, 14, 14), out.shape
    assert jnp.allclose(out, ref, atol=1e-4, rtol=1e-4), "mismatch vs lax reference"

    print("KERNEL_OK")
</pallas_src>

<mosaic_0001>
module attributes {stable_mosaic.version = 11 : i64} {
  func.func @conv2d_mm_kernel(%arg0: i32, %arg1: memref<32x512xf32, #tpu.memory_space<vmem>>, %arg2: memref<8x32xf32, #tpu.memory_space<vmem>>, %arg3: memref<8x512xf32, #tpu.memory_space<vmem>>) attributes {dimension_semantics = [#tpu.dimension_semantics<parallel>], iteration_bounds = array<i64: 1>, scalar_prefetch = 0 : i64, scratch_operands = 0 : i64, tpu.core_type = #tpu.core_type<tc>, window_params = [{transform_indices = @transform_0, window_bounds = array<i64: 32, 512>}, {pipeline_mode = #tpu.pipeline_mode<synchronous>, transform_indices = @transform_1, window_bounds = array<i64: 8, 32>}, {transform_indices = @transform_2, window_bounds = array<i64: 8, 512>}]} {
    %c0 = arith.constant 0 : index
    %c0_0 = arith.constant 0 : index
    %0 = vector.load %arg2[%c0, %c0_0] : memref<8x32xf32, #tpu.memory_space<vmem>>, vector<8x32xf32>
    %c0_1 = arith.constant 0 : index
    %c0_2 = arith.constant 0 : index
    %1 = vector.load %arg1[%c0_1, %c0_2] : memref<32x512xf32, #tpu.memory_space<vmem>>, vector<32x512xf32>
    %cst = arith.constant dense<0.000000e+00> : vector<8x512xf32>
    %2 = tpu.matmul %0, %1, %cst {dimension_numbers = #tpu.dot_dimension_numbers<[1], [0], [0], [1], [0, 0, 1, 1], [], []>} : vector<8x32xf32>, vector<32x512xf32>, vector<8x512xf32> -> vector<8x512xf32>
    %c0_3 = arith.constant 0 : index
    %c0_4 = arith.constant 0 : index
    %3 = vector.load %arg3[%c0_3, %c0_4] : memref<8x512xf32, #tpu.memory_space<vmem>>, vector<8x512xf32>
    tpu.vector_store %arg3[%c0_3, %c0_4], %2 {strides = array<i32>} : memref<8x512xf32, #tpu.memory_space<vmem>>, vector<8x512xf32>,
    return
  }
  func.func @transform_0(%arg0: i32) -> (i32, i32) {
    %c0_i32 = arith.constant 0 : i32
    %c0_i32_0 = arith.constant 0 : i32
    return %c0_i32, %arg0 : i32, i32
  }
  func.func @transform_1(%arg0: i32) -> (i32, i32) {
    %c0_i32 = arith.constant 0 : i32
    %c0_i32_0 = arith.constant 0 : i32
    %c0_i32_1 = arith.constant 0 : i32
    return %c0_i32, %c0_i32_0 : i32, i32
  }
  func.func @transform_2(%arg0: i32) -> (i32, i32) {
    %c0_i32 = arith.constant 0 : i32
    %c0_i32_0 = arith.constant 0 : i32
    return %c0_i32, %arg0 : i32, i32
  }
}

</mosaic_0001>

<bundles_post_ra>
// kernel: tpu_custom_call.1
= control target key start
LH: loop header
LB: loop body
LE: loop exit
PB: predicated region body
PF: predicated region fallthrough
CT: control target
= control target key end

     0   :  { %7 = vsyncpa [#allocation3], 0  ;;  %s285_s0 = inlined_call_operand.hbm [shape: f32[32,512], index: 0, kind: input, shape index: {}]   ;;  %s286_s1 = inlined_call_operand.hbm [shape: f32[8,32], index: 1, kind: input, shape index: {}]   ;;  %s287_s2 = inlined_call_operand.hbm [shape: f32[8,512], index: 2, kind: output, shape index: {}]  }
   0x1   :  { %8 = vsyncpa [#allocation6], 0 }
   0x2   :  { %9 = vsyncpa [#allocation4], 0  ;;  %s14_s11 = sshll.u32 %s285_s0, 4  ;;  %s252_s12 = smov [#allocation2]   ;;  %s15_s11 = int_to_ptr.hbm [resolvable:$true] %s14_s11 }
   0x3   :  { %s16_s13 = sshll.u32 %s252_s12, 4  ;;  %s28_s16 = sshll.u32 %s286_s1, 4  ;;  %s17_s13 = int_to_ptr.vmem [resolvable:$true] %s16_s13  ;;  %s29_s16 = int_to_ptr.hbm [resolvable:$true] %s28_s16 }
   0x4   :  { %s253_s17 = smov 512   ;;  %s254_s18 = smov 32  }
   0x5   :  { %22 = dma.hbm_to_vmem [thread:$0]  %s15_s11, 2048, %s17_s13, [#allocation3], %s253_s17, %s253_s17, %s254_s18  }
   0x6   :  { %s255_s19 = smov [#allocation5]  }
   0x7   :  { %s30_s20 = sshll.u32 %s255_s19, 4  ;;  %s31_s20 = int_to_ptr.vmem [resolvable:$true] %s30_s20 }
   0x8   :  { %33 = dma.hbm_to_vmem [thread:$0]  %s29_s16, 128, %s31_s20, [#allocation6]  }
   0x9   :  { %246 = dma.done.wait [#allocation3], 2048  }
   0xa   :  { %247 = vsyncadd [#allocation3], 4294965248 }
   0xb   :  { %248 = dma.done.wait [#allocation6], 128  }
   0xc   :  { %249 = vsyncadd [#allocation6], 4294967168  ;;  %v57_v0 = vld [vmem:[#allocation2 + $0x70] sm:$0xff]  ;;  %v58_v1 = vld [vmem:[#allocation2 + $0x78] sm:$0xff]  ;;  %vm59_vm0 = vcmask 261120   ;;  %s256_s0 = smov [#allocation7]  }
   0xd   :  { %v53_v2 = vld [vmem:[#allocation2 + $0x50] sm:$0xff]  ;;  %115 = vmatpush.msra.mxu2 %v57_v0  ;;  %135 = vmatpush.msra.mxu3 %v58_v1  ;;  %v54_v3 = vld [vmem:[#allocation2 + $0x58] sm:$0xff]  ;;  %v55_v6 = vld [vmem:[#allocation2 + $0x60] sm:$0xff]  ;;  %s152_s1 = sshll.u32 %s256_s0, 4  ;;  %s154_s23 = sshll.u32 %s287_s2, 4  ;;  %s153_s1 = int_to_ptr.vmem [resolvable:$true] %s152_s1  ;;  %s155_s23 = int_to_ptr.hbm [resolvable:$true] %s154_s23 }
   0xe   :  { %v49_v4 = vld [vmem:[#allocation2 + $0x30] sm:$0xff]  ;;  %v50_v5 = vld [vmem:[#allocation2 + $0x38] sm:$0xff]  ;;  %v56_v7 = vld [vmem:[#allocation2 + $0x68] sm:$0xff]  ;;  %75 = vmatpush.msra.mxu0 %v55_v6 }
   0xf   :  { %116 = vmatpush.msra.mxu2 %v53_v2  ;;  %136 = vmatpush.msra.mxu3 %v54_v3  ;;  %v51_v8 = vld [vmem:[#allocation2 + $0x40] sm:$0xff]  ;;  %v45_v9 = vld [vmem:[#allocation2 + $0x10] sm:$0xff]  ;;  %v46_v10 = vld [vmem:[#allocation2 + $0x18] sm:$0xff] }
  0x10   :  { %95 = vmatpush.msra.mxu1 %v56_v7  ;;  %v52_v11 = vld [vmem:[#allocation2 + $0x48] sm:$0xff]  ;;  %v42_v12 = vld [vmem:[#allocation5] sm:$0xff]  ;;  %76 = vmatpush.msra.mxu0 %v51_v8 }
  0x11   :  { %117 = vmatpush.msra.mxu2 %v49_v4  ;;  %137 = vmatpush.msra.mxu3 %v50_v5  ;;  %v47_v13 = vld [vmem:[#allocation2 + $0x20] sm:$0xff]  ;;  %v48_v14 = vld [vmem:[#allocation2 + $0x28] sm:$0xff] }
  0x12   :  { %96 = vmatpush.msra.mxu1 %v52_v11  ;;  %v43_v15 = vld [vmem:[#allocation2] sm:$0xff]  ;;  %v44_v16 = vld [vmem:[#allocation2 + $0x8] sm:$0xff]  ;;  %77 = vmatpush.msra.mxu0 %v47_v13 }
  0x13   :  { %118 = vmatpush.msra.mxu2 %v45_v9  ;;  %138 = vmatpush.msra.mxu3 %v46_v10 }
  0x14   :  { %167 = vmatmul.msk.f32.vlgmr.msra.gmra.mxu2 %vm59_vm0, %v42_v12  ;;  %168 = vmatmul.msk.f32.vlgmr.msra.gmra.mxu3 %vm59_vm0, %v42_v12 }
  0x15   :  { %97 = vmatpush.msra.mxu1 %v48_v14  ;;  %78 = vmatpush.msra.mxu0 %v43_v15 }
  0x16   :  { %165 = vmatmul.msk.f32.vlgmr.msra.gmra.mxu0 %vm59_vm0, %v42_v12 }
  0x17   :  { %98 = vmatpush.msra.mxu1 %v44_v16 }
  0x18   :  { %166 = vmatmul.msk.f32.vlgmr.msra.gmra.mxu1 %vm59_vm0, %v42_v12 }
  0x93   :  { %v80_v17 = vpop.f32.mrf.mxu0 }
  0x94   :  { %143 = vst [vmem:[#allocation7] sm:$0xff] %v80_v17 }
  0x95   :  { %v100_v18 = vpop.f32.mrf.mxu1 }
  0x96   :  { %144 = vst [vmem:[#allocation7 + $0x8] sm:$0xff] %v100_v18 }
  0x97   :  { %v120_v19 = vpop.f32.mrf.mxu2  ;;  %v140_v20 = vpop.f32.mrf.mxu3 }
  0x98   :  { %145 = vst [vmem:[#allocation7 + $0x10] sm:$0xff] %v120_v19 }
  0x99   :  { %146 = vst [vmem:[#allocation7 + $0x18] sm:$0xff] %v140_v20 }
  0x9a   :  { %157 = dma.vmem_to_hbm [thread:$0]  %s153_s1, 512, %s155_s23, [#allocation4]  }
  0x9b   :  { %250 = dma.done.wait [#allocation4], 512  }
  0x9c   :  { %251 = vsyncadd [#allocation4], 4294966784 }
  0x9d   :  { %162 = vsyncpa [#allocation3], 1 }
  0x9e   :  { %163 = vsyncpa [#allocation6], 1 }
  0x9f   :  { %164 = vsyncpa [#allocation4], 1 }

</bundles_post_ra>
